<compile_context>
chip_gen: v7x
topology: tpu7x:2x2x1
jax: 0.10.0
libtpu: 0.0.40
codegen_flags: <defaults>
</compile_context>

<pallas_src>
import functools

import jax
import jax.numpy as jnp
from jax.experimental import pallas as pl
from jax.experimental.pallas import tpu as pltpu


_MAX_TILE_N = 16384   # batch columns per grid step for large N
_SMALL_N = 256        # at or below this, run a single full-array tile


def _round_up(v, m):
    return ((v + m - 1) // m) * m


# ----------------------------------------------------------------------------
# Pallas kernel: fused MLP forward + sigmoid + BCE-from-logits + accuracy.
# Grid: 1-D over batch tiles.  x arrives in its natural [T, D] layout; the
# matmul contracts on D so everything downstream is lane-dense [*, T].
# ----------------------------------------------------------------------------
def _mlp_bce_kernel(x_ref, y_ref, w1t_ref, b1_ref, w2_ref, b2_ref,
                    ys_ref, loss_ref, acc_ref, *, n_total, tile_n, mask_last):
    # ----- layer 1 on the MXU: bf16 inputs, f32 accumulation ----------------
    x_bf = x_ref[...].astype(jnp.bfloat16)                      # [T, D]
    h = jnp.einsum("hd,td->ht", w1t_ref[...], x_bf,
                   preferred_element_type=jnp.float32)          # [H, T] f32

    # ----- fused bias + ReLU + layer-2 scale + sublane reduce + bias2 -------
    z = jnp.sum(w2_ref[...] * jnp.maximum(h + b1_ref[...], 0.0),
                axis=0, keepdims=True) + b2_ref[0]              # [1, T] f32

    # ----- one EUP exp serves both sigmoid and the BCE softplus term --------
    e = jnp.exp(-jnp.abs(z))                                    # [1, T]
    inv = 1.0 / (1.0 + e)
    ys = jnp.where(z >= 0.0, inv, e * inv)                      # exact sigmoid
    ys_ref[...] = ys                                            # lane-dense store

    y = y_ref[...]                                              # [1, T] in {0,1}

    # BCE from logits (stable): softplus(z) - y*z, softplus(z)=max(z,0)+log(1+e)
    bce = jnp.maximum(z, 0.0) - y * z + jnp.log(1.0 + e)

    # hat_ys = (sigmoid(z) >= 0.5) <=> (z >= 0); exact, threshold-safe.
    correct = ((z >= 0.0).astype(jnp.float32) == y).astype(jnp.float32)

    if not mask_last:
        # Every tile is full (static) -> plain sums, no iota/mask work.
        loss_ref[0, 0] = jnp.sum(bce)
        acc_ref[0, 0] = jnp.sum(correct)
    else:
        is_last = pl.program_id(0) == pl.num_programs(0) - 1

        @pl.when(jnp.logical_not(is_last))
        def _():
            loss_ref[0, 0] = jnp.sum(bce)
            acc_ref[0, 0] = jnp.sum(correct)

        @pl.when(is_last)
        def _():
            col = (jax.lax.broadcasted_iota(jnp.int32, z.shape, 1)
                   + pl.program_id(0) * tile_n)
            valid = col < n_total
            loss_ref[0, 0] = jnp.sum(jnp.where(valid, bce, 0.0))
            acc_ref[0, 0] = jnp.sum(jnp.where(valid, correct, 0.0))


def _run_mlp_bce(x, y_row, w1t_bf, b1, w2, b2):
    n, d = x.shape
    hdim = w1t_bf.shape[0]

    # Tile selection (static): single full tile for tiny N; otherwise at
    # least two 128-multiple tiles (keeps both v7x TCs busy); cap at
    # _MAX_TILE_N for large N so the padded [T, D] f32 x block (double
    # buffered) stays well under v7x's 64 MiB VMEM.
    if n <= _SMALL_N:
        tile_n = n
    elif n <= 2 * _MAX_TILE_N:
        tile_n = _round_up(-(-n // 2), 128)
    else:
        tile_n = _MAX_TILE_N
    num_tiles = -(-n // tile_n)
    mask_last = (n % tile_n) != 0

    smem = pltpu.MemorySpace.SMEM
    kernel = functools.partial(_mlp_bce_kernel, n_total=n, tile_n=tile_n,
                               mask_last=mask_last)

    cp = dict(dimension_semantics=("parallel",))   # shards over v7x's 2 TCs
    if tile_n > 8192:
        # ~28 MiB worst-case footprint at tile 16384 (padded x blocks x2,
        # bf16 copy, [H,T] f32 intermediate, rows); stay under v7x physical.
        cp["vmem_limit_bytes"] = 48 * 1024 * 1024

    ys, loss_part, acc_part = pl.pallas_call(
        kernel,
        grid=(num_tiles,),
        out_shape=(
            jax.ShapeDtypeStruct((1, n), jnp.float32),          # ys (lane-dense)
            jax.ShapeDtypeStruct((num_tiles, 1), jnp.float32),  # partial BCE sums
            jax.ShapeDtypeStruct((num_tiles, 1), jnp.float32),  # partial correct
        ),
        in_specs=[
            pl.BlockSpec((tile_n, d), lambda i: (i, 0)),        # x tile, natural layout
            pl.BlockSpec((1, tile_n), lambda i: (0, i)),        # y tile (f32 row)
            pl.BlockSpec((hdim, d), lambda i: (0, 0)),          # w1T (bf16), resident
            pl.BlockSpec((hdim, 1), lambda i: (0, 0)),          # b1, resident
            pl.BlockSpec((hdim, 1), lambda i: (0, 0)),          # w2, resident
            pl.BlockSpec(memory_space=smem),                    # b2 scalar (SMEM)
        ],
        out_specs=(
            pl.BlockSpec((1, tile_n), lambda i: (0, i)),
            pl.BlockSpec((1, 1), lambda i: (i, 0), memory_space=smem),
            pl.BlockSpec((1, 1), lambda i: (i, 0), memory_space=smem),
        ),
        compiler_params=pltpu.CompilerParams(**cp),
    )(x, y_row, w1t_bf, b1, w2, b2)

    inv_n = 1.0 / n
    return ys[0], jnp.sum(loss_part) * inv_n, jnp.sum(acc_part) * inv_n


# ----------------------------------------------------------------------------
# Glue (plain JAX): rank-based AUC, parameter init, RegressionTrain.forward.
# ----------------------------------------------------------------------------
def _roc_auc(y, scores):
    """Sort/rank-based roc_auc_score (ties averaged); O(N log N)."""
    y = y.astype(jnp.float32)
    sorted_scores = jnp.sort(scores)
    lo = jnp.searchsorted(sorted_scores, scores, side="left").astype(jnp.float32)
    hi = jnp.searchsorted(sorted_scores, scores, side="right").astype(jnp.float32)
    ranks = 0.5 * (lo + hi + 1.0)          # 1-based average ranks
    n_pos = jnp.sum(y)
    n_neg = jnp.sum(1.0 - y)
    num = jnp.sum(ranks * y) - n_pos * (n_pos + 1.0) * 0.5
    den = n_pos * n_neg
    # sklearn raises on a single-class batch; we return NaN instead.
    return jnp.where(den > 0, num / den, jnp.nan)


def _xavier_uniform(key, shape, scale=0.1):
    fan_out, fan_in = shape  # PyTorch Linear weight is [out, in]
    bound = (6.0 / (fan_in + fan_out)) ** 0.5
    return scale * jax.random.uniform(key, shape, jnp.float32, -bound, bound)


def init_params(key, in_features, hidden):
    k1, k2 = jax.random.split(key)
    w1_t = _xavier_uniform(k1, (hidden, in_features))    # torch layout [H, D]
    w2_t = _xavier_uniform(k2, (1, hidden))               # torch layout [1, H]
    return {
        "w1t": w1_t,                                      # [H, D] (kernel layout)
        "b1": jnp.zeros((hidden, 1), jnp.float32),        # [H, 1]
        "b2": jnp.zeros((1,), jnp.float32),                # scalar (SMEM)
        "w2": jnp.asarray(w2_t.T),                         # [H, 1]
    }


@functools.partial(jax.jit, static_argnames=("sensitive_group", "baseline_type"))
def regression_train_forward(params, x, y, A, delta_g,
                             sensitive_group=4, baseline_type="none"):
    # baseline_type == 'none' path of RegressionTrain.forward
    del A, delta_g, sensitive_group, baseline_type

    # x is consumed directly in its natural [N, D] layout -- no wrapper-side
    # transpose / cast pre-pass (that pass cost ~2.5-3x the kernel's HBM traffic).
    y_row = y.astype(jnp.float32).reshape(1, -1)          # free reshape

    ys, task_loss, accs = _run_mlp_bce(
        x, y_row,
        params["w1t"].astype(jnp.bfloat16),               # 32x32, negligible
        params["b1"], params["w2"], params["b2"])

    aucs = _roc_auc(y.astype(jnp.float32), ys)

    # TODO(synk): get_multi_group_disparity unavailable -> zero placeholders.
    pred_dis = jnp.zeros((), jnp.float32)
    disparitys = jnp.zeros((), jnp.float32)
    task_loss_as = jnp.zeros((0,), jnp.float32)
    return task_loss, accs, aucs, pred_dis, disparitys, ys, task_loss_as


if __name__ == "__main__":
    N, D, H = 8, 32, 32
    key = jax.random.PRNGKey(0)
    k_param, k_x, k_y, k_a = jax.random.split(key, 4)

    params = init_params(k_param, D, H)
    x = jax.random.normal(k_x, (N, D), jnp.float32)
    y = jax.random.bernoulli(k_y, 0.5, (N,)).astype(jnp.float32)
    A = jax.random.randint(k_a, (N,), 0, 4)
    delta_g = jnp.float32(0.1)

    out = regression_train_forward(params, x, y, A, delta_g)
    out = jax.block_until_ready(out)

    task_loss, accs, aucs, pred_dis, disparitys, ys, task_loss_as = out
    assert ys.shape == (N,)
    assert bool(jnp.isfinite(task_loss)) and bool(jnp.isfinite(accs))
    assert 0.0 <= float(accs) <= 1.0
    print("KERNEL_OK")
</pallas_src>

<mosaic_0001>
module attributes {stable_mosaic.version = 11 : i64} {
  func.func @_mlp_bce_kernel(%arg0: i32, %arg1: memref<8x32xf32, #tpu.memory_space<vmem>>, %arg2: memref<1x8xf32, #tpu.memory_space<vmem>>, %arg3: memref<32x32xbf16, #tpu.memory_space<vmem>>, %arg4: memref<32x1xf32, #tpu.memory_space<vmem>>, %arg5: memref<32x1xf32, #tpu.memory_space<vmem>>, %arg6: memref<1xf32, #tpu.memory_space<smem>>, %arg7: memref<1x8xf32, #tpu.memory_space<vmem>>, %arg8: memref<1x1xf32, #tpu.memory_space<smem>>, %arg9: memref<1x1xf32, #tpu.memory_space<smem>>) attributes {dimension_semantics = [#tpu.dimension_semantics<parallel>], iteration_bounds = array<i64: 1>, scalar_prefetch = 0 : i64, scratch_operands = 0 : i64, tpu.core_type = #tpu.core_type<tc>, window_params = [{transform_indices = @transform_0, window_bounds = array<i64: 8, 32>}, {transform_indices = @transform_1, window_bounds = array<i64: 1, 8>}, {pipeline_mode = #tpu.pipeline_mode<synchronous>, transform_indices = @transform_2, window_bounds = array<i64: 32, 32>}, {pipeline_mode = #tpu.pipeline_mode<synchronous>, transform_indices = @transform_3, window_bounds = array<i64: 32, 1>}, {pipeline_mode = #tpu.pipeline_mode<synchronous>, transform_indices = @transform_4, window_bounds = array<i64: 32, 1>}, {transform_indices = @transform_5, window_bounds = array<i64: 1>}, {transform_indices = @transform_6, window_bounds = array<i64: 1, 8>}, {transform_indices = @transform_7, window_bounds = array<i64: 1, 1>}, {transform_indices = @transform_8, window_bounds = array<i64: 1, 1>}]} {
    %c0 = arith.constant 0 : index
    %c0_0 = arith.constant 0 : index
    %0 = vector.load %arg1[%c0, %c0_0] : memref<8x32xf32, #tpu.memory_space<vmem>>, vector<8x32xf32>
    %1 = arith.truncf %0 : vector<8x32xf32> to vector<8x32xbf16>
    %c0_1 = arith.constant 0 : index
    %c0_2 = arith.constant 0 : index
    %2 = vector.load %arg3[%c0_1, %c0_2] : memref<32x32xbf16, #tpu.memory_space<vmem>>, vector<32x32xbf16>
    "tpu.trace_start"() <{level = 10 : i32, message = "hd,td->ht"}> : () -> ()
    %cst = arith.constant dense<0.000000e+00> : vector<32x8xf32>
    %3 = tpu.matmul %2, %1, %cst {dimension_numbers = #tpu.dot_dimension_numbers<[1], [1], [0], [0], [0, 0, 1, 0], [], []>} : vector<32x32xbf16>, vector<8x32xbf16>, vector<32x8xf32> -> vector<32x8xf32>
    "tpu.trace_stop"() : () -> ()
    %c0_3 = arith.constant 0 : index
    %c0_4 = arith.constant 0 : index
    %4 = vector.load %arg5[%c0_3, %c0_4] : memref<32x1xf32, #tpu.memory_space<vmem>>, vector<32x1xf32>
    %c0_5 = arith.constant 0 : index
    %c0_6 = arith.constant 0 : index
    %5 = vector.load %arg4[%c0_5, %c0_6] : memref<32x1xf32, #tpu.memory_space<vmem>>, vector<32x1xf32>
    %6 = vector.broadcast %5 : vector<32x1xf32> to vector<32x8xf32>
    %7 = arith.addf %3, %6 : vector<32x8xf32>
    %cst_7 = arith.constant 0.000000e+00 : f32
    %8 = vector.broadcast %cst_7 : f32 to vector<32x8xf32>
    %9 = arith.maximumf %7, %8 : vector<32x8xf32>
    %10 = vector.broadcast %4 : vector<32x1xf32> to vector<32x8xf32>
    %11 = arith.mulf %10, %9 : vector<32x8xf32>
    %cst_8 = arith.constant dense<0.000000e+00> : vector<8xf32>
    %12 = vector.multi_reduction <add>, %11, %cst_8 [0] : vector<32x8xf32> to vector<8xf32>
    %13 = vector.shape_cast %12 : vector<8xf32> to vector<1x8xf32>
    %c0_9 = arith.constant 0 : index
    %14 = memref.load %arg6[%c0_9] : memref<1xf32, #tpu.memory_space<smem>>
    %15 = vector.broadcast %14 : f32 to vector<1x8xf32>
    %16 = arith.addf %13, %15 : vector<1x8xf32>
    %17 = math.absf %16 : vector<1x8xf32>
    %cst_10 = arith.constant 0.000000e+00 : f32
    %18 = vector.broadcast %cst_10 : f32 to vector<1x8xf32>
    %19 = arith.subf %18, %17 : vector<1x8xf32>
    %20 = math.exp %19 : vector<1x8xf32>
    %cst_11 = arith.constant 1.000000e+00 : f32
    %21 = vector.broadcast %cst_11 : f32 to vector<1x8xf32>
    %22 = arith.addf %21, %20 : vector<1x8xf32>
    %cst_12 = arith.constant 1.000000e+00 : f32
    %23 = vector.broadcast %cst_12 : f32 to vector<1x8xf32>
    %24 = arith.divf %23, %22 : vector<1x8xf32>
    %cst_13 = arith.constant 0.000000e+00 : f32
    %25 = vector.broadcast %cst_13 : f32 to vector<1x8xf32>
    %26 = arith.cmpf oge, %16, %25 : vector<1x8xf32>
    %27 = arith.mulf %20, %24 : vector<1x8xf32>
    %28 = arith.select %26, %24, %27 : vector<1x8xi1>, vector<1x8xf32>
    %c0_14 = arith.constant 0 : index
    %c0_15 = arith.constant 0 : index
    %29 = vector.load %arg7[%c0_14, %c0_15] : memref<1x8xf32, #tpu.memory_space<vmem>>, vector<1x8xf32>
    tpu.vector_store %arg7[%c0_14, %c0_15], %28 {strides = array<i32>} : memref<1x8xf32, #tpu.memory_space<vmem>>, vector<1x8xf32>,
    %c0_16 = arith.constant 0 : index
    %c0_17 = arith.constant 0 : index
    %30 = vector.load %arg2[%c0_16, %c0_17] : memref<1x8xf32, #tpu.memory_space<vmem>>, vector<1x8xf32>
    %cst_18 = arith.constant 0.000000e+00 : f32
    %31 = vector.broadcast %cst_18 : f32 to vector<1x8xf32>
    %32 = arith.maximumf %16, %31 : vector<1x8xf32>
    %33 = arith.mulf %30, %16 : vector<1x8xf32>
    %34 = arith.subf %32, %33 : vector<1x8xf32>
    %cst_19 = arith.constant 1.000000e+00 : f32
    %35 = vector.broadcast %cst_19 : f32 to vector<1x8xf32>
    %36 = arith.addf %35, %20 : vector<1x8xf32>
    %37 = math.log %36 : vector<1x8xf32>
    %38 = arith.addf %34, %37 : vector<1x8xf32>
    %cst_20 = arith.constant 0.000000e+00 : f32
    %39 = vector.broadcast %cst_20 : f32 to vector<1x8xf32>
    %40 = arith.cmpf oge, %16, %39 : vector<1x8xf32>
    %41 = arith.extui %40 : vector<1x8xi1> to vector<1x8xi32>
    %42 = arith.sitofp %41 : vector<1x8xi32> to vector<1x8xf32>
    %43 = arith.cmpf oeq, %42, %30 : vector<1x8xf32>
    %44 = arith.extui %43 : vector<1x8xi1> to vector<1x8xi32>
    %45 = arith.sitofp %44 : vector<1x8xi32> to vector<1x8xf32>
    %46 = vector.shape_cast %38 : vector<1x8xf32> to vector<1x1x8xf32>
    %cst_21 = arith.constant dense<0.000000e+00> : vector<1xf32>
    %47 = vector.multi_reduction <add>, %46, %cst_21 [1, 2] : vector<1x1x8xf32> to vector<1xf32>
    %48 = vector.shape_cast %47 : vector<1xf32> to vector<1x1x1xf32>
    %49 = vector.extract %48[0, 0, 0] : f32 from vector<1x1x1xf32>
    %c0_22 = arith.constant 0 : index
    %c0_23 = arith.constant 0 : index
    %50 = memref.load %arg8[%c0_22, %c0_23] : memref<1x1xf32, #tpu.memory_space<smem>>
    memref.store %49, %arg8[%c0_22, %c0_23] : memref<1x1xf32, #tpu.memory_space<smem>>
    %51 = vector.shape_cast %45 : vector<1x8xf32> to vector<1x1x8xf32>
    %cst_24 = arith.constant dense<0.000000e+00> : vector<1xf32>
    %52 = vector.multi_reduction <add>, %51, %cst_24 [1, 2] : vector<1x1x8xf32> to vector<1xf32>
    %53 = vector.shape_cast %52 : vector<1xf32> to vector<1x1x1xf32>
    %54 = vector.extract %53[0, 0, 0] : f32 from vector<1x1x1xf32>
    %c0_25 = arith.constant 0 : index
    %c0_26 = arith.constant 0 : index
    %55 = memref.load %arg9[%c0_25, %c0_26] : memref<1x1xf32, #tpu.memory_space<smem>>
    memref.store %54, %arg9[%c0_25, %c0_26] : memref<1x1xf32, #tpu.memory_space<smem>>
    return
  }
  func.func @transform_0(%arg0: i32) -> (i32, i32) {
    %c0_i32 = arith.constant 0 : i32
    %c0_i32_0 = arith.constant 0 : i32
    return %arg0, %c0_i32 : i32, i32
  }
  func.func @transform_1(%arg0: i32) -> (i32, i32) {
    %c0_i32 = arith.constant 0 : i32
    %c0_i32_0 = arith.constant 0 : i32
    return %c0_i32, %arg0 : i32, i32
  }
  func.func @transform_2(%arg0: i32) -> (i32, i32) {
    %c0_i32 = arith.constant 0 : i32
    %c0_i32_0 = arith.constant 0 : i32
    %c0_i32_1 = arith.constant 0 : i32
    return %c0_i32, %c0_i32_0 : i32, i32
  }
  func.func @transform_3(%arg0: i32) -> (i32, i32) {
    %c0_i32 = arith.constant 0 : i32
    %c0_i32_0 = arith.constant 0 : i32
    %c0_i32_1 = arith.constant 0 : i32
    return %c0_i32, %c0_i32_0 : i32, i32
  }
  func.func @transform_4(%arg0: i32) -> (i32, i32) {
    %c0_i32 = arith.constant 0 : i32
    %c0_i32_0 = arith.constant 0 : i32
    %c0_i32_1 = arith.constant 0 : i32
    return %c0_i32, %c0_i32_0 : i32, i32
  }
  func.func @transform_5(%arg0: i32) -> i32 {
    %c0_i32 = arith.constant 0 : i32
    %c0_i32_0 = arith.constant 0 : i32
    return %c0_i32 : i32
  }
  func.func @transform_6(%arg0: i32) -> (i32, i32) {
    %c0_i32 = arith.constant 0 : i32
    %c0_i32_0 = arith.constant 0 : i32
    return %c0_i32, %arg0 : i32, i32
  }
  func.func @transform_7(%arg0: i32) -> (i32, i32) {
    %c0_i32 = arith.constant 0 : i32
    %c0_i32_0 = arith.constant 0 : i32
    return %arg0, %c0_i32 : i32, i32
  }
  func.func @transform_8(%arg0: i32) -> (i32, i32) {
    %c0_i32 = arith.constant 0 : i32
    %c0_i32_0 = arith.constant 0 : i32
    return %arg0, %c0_i32 : i32, i32
  }
}

</mosaic_0001>

<bundles_post_ra>
// kernel: custom-call
= control target key start
LH: loop header
LB: loop body
LE: loop exit
PB: predicated region body
PF: predicated region fallthrough
CT: control target
= control target key end

     0   :  { %s6_s0 = inlined_call_operand.vmem [shape: u32[8], index: 0, kind: output, shape index: {}]  }

// kernel: regression_train_forward.1
= control target key start
LH: loop header
LB: loop body
LE: loop exit
PB: predicated region body
PF: predicated region fallthrough
CT: control target
= control target key end

     0   :  { %15 = vsyncpa [#allocation4], 0  ;;  %vm74_vm0 = vcmask 261120   ;;  %v313_v3 = vmov 0   ;;  %s437_s0 = inlined_call_operand.vmem [shape: f32[8,32], index: 0, kind: input, shape index: {}]   ;;  %s438_s1 = inlined_call_operand.vmem [shape: f32[1,8], index: 1, kind: input, shape index: {}]   ;;  %s439_s2 = inlined_call_operand.vmem [shape: bf16[32,32], index: 2, kind: input, shape index: {}]   ;;  %s440_s3 = inlined_call_operand.vmem [shape: f32[32,1], index: 3, kind: input, shape index: {}]   ;;  %s441_s4 = inlined_call_operand.vmem [shape: f32[32,1], index: 4, kind: input, shape index: {}]   ;;  %s442_s5 = inlined_call_operand.<no memory space> [shape: f32[1], index: 5, kind: input, shape index: {}]   ;;  %s443_s6 = inlined_call_operand.vmem [shape: f32[1,8], index: 6, kind: output, shape index: {0}]   ;;  %s444_s7 = inlined_call_operand.hbm [shape: f32[1,1], index: 7, kind: output, shape index: {1}]   ;;  %s445_s8 = inlined_call_operand.hbm [shape: f32[1,1], index: 8, kind: output, shape index: {2}]  }
   0x1   :  { %v30_v0 = vld [vmem:[%s437_s0] sm:$0xff]  ;;  %279 = vset.pattern.permute.xlu0 %v313_v3  ;;  %280 = vset.pattern.permute.xlu1 %v313_v3  ;;  %v42_v5 = vld [vmem:[%s440_s3 + $0x10] sm:$0xff]  ;;  %v41_v7 = vld [vmem:[%s440_s3 + $0x8] sm:$0xff] }
   0x2   :  { %v31_v1 = vpack.c.bf16 %v30_v0, %v30_v0  ;;  %v281_v2 = vld [vmem:[%s439_s2] sm:$0xff]   ;;  %56 = vperm.xlu1 %280, %v42_v5  }
   0x3   :  { %v40_v4 = vld [vmem:[%s440_s3] sm:$0xff]  ;;  %266 = vmatprep.mubr.msk.bf16.mxu0 %vm74_vm0, %v281_v2 }
   0x4   :  { %270 = vmatprep.subr.msk.bf16.mxu0 %vm74_vm0, %v31_v1  ;;  %v82_v6 = vsel %vm74_vm0, %v31_v1, 0  ;;  %46 = vperm.xlu0 %279, %v40_v4  }
   0x5   :  { %265 = vmatpush3.bf16.xpose.msra.mxu0 %v82_v6 }
   0x6   :  { %16 = vsyncpa [#allocation6], 0  ;;  %v43_v8 = vld [vmem:[%s440_s3 + $0x18] sm:$0xff]  ;;  %v282_v9 = vld [vmem:[%s439_s2 + $0x8] sm:$0xff]   ;;  %vm161_vm1 = vcmask 64512   ;;  %v176_v50 = vstv %s442_s5  ;;  %vm188_vm3 = vcmask 57344  }
   0x7   :  { %61 = vperm.xlu1 %280, %v43_v8   ;;  %v36_v10 = vld [vmem:[%s441_s4] sm:$0xff]  ;;  %v37_v11 = vld [vmem:[%s441_s4 + $0x8] sm:$0xff]  ;;  %v38_v12 = vld [vmem:[%s441_s4 + $0x10] sm:$0xff]  ;;  %v314_v55 = vmov 0.0   ;;  %s289_s30 = scalar_lea.hbm %s444_s7, 16 }
   0x8   :  { %51 = vperm.xlu0 %279, %v41_v7   ;;  %v39_v13 = vld [vmem:[%s441_s4 + $0x18] sm:$0xff]  ;;  %v190_v54 = vld [vmem:[%s438_s1] sm:$0x1]  ;;  %p290_p0 = scmp.ne.s32.totalorder %s444_s7, %s289_s30  ;;  %p293_p1 = scmp.lt.u32.totalorder %s289_s30, %s444_s7 }
   0xa   :  { %p295_p2 = pnand %p293_p1, %p290_p0 }
   0xb   :  { %144 = vperm.xlu1 %280, %v37_v11  }
   0xc   :  { %267 = vmatmul.mubr.msk.bf16.vlgmr.msra.gmra.mrb[0].mxu0 %vm74_vm0, %v282_v9  ;;  %139 = vperm.xlu0 %279, %v36_v10  }
   0xf   :  { %154 = vperm.xlu1 %280, %v39_v13  }
  0x10   :  { %149 = vperm.xlu0 %279, %v38_v12  }
  0x81   :  { %v57_v15 = vpop.permute.xlu1 %56 }
  0x83   :  { %v47_v14 = vpop.permute.xlu0 %46 }
  0x86   :  { %v62_v17 = vpop.permute.xlu1 %61 }
  0x87   :  { %v52_v16 = vpop.permute.xlu0 %51 }
  0x8a   :  { %v145_v24 = vpop.permute.xlu1 %144 }
  0x8b   :  { %v140_v19 = vpop.permute.xlu0 %139 }
  0x8e   :  { %v155_v36 = vpop.permute.xlu1 %154 }
  0x8f   :  { %v150_v33 = vpop.permute.xlu0 %149 }
  0xdf   :  { %v268_v18 = vpop.f32.mrb[0].mxu0 }
  0xe0   :  { %v127_v20 = vadd.f32 %v268_v18, %v57_v15  ;;  %v118_v21 = vpop.f32.mrb[1].mxu0 }
  0xe1   :  { %v119_v22 = vadd.f32 %v118_v21, %v47_v14  ;;  %v269_v23 = vpop.f32.mrb[2].mxu0 }
  0xe2   :  { %v130_v25 = vadd.f32 %v269_v23, %v62_v17  ;;  %v121_v26 = vpop.f32.mrb[3].mxu0  ;;  %v135_v27 = vmax.f32 %v127_v20, 0.0 }
  0xe3   :  { %v133_v28 = vmax.f32 %v119_v22, 0.0  ;;  %v122_v29 = vadd.f32 %v121_v26, %v52_v16 }
  0xe4   :  { %v136_v31 = vmax.f32 %v130_v25, 0.0  ;;  %v159_v34 = vmul.f32 %v150_v33, %v135_v27 }
  0xe5   :  { %v157_v30 = vmul.f32 %v140_v19, %v133_v28  ;;  %v134_v32 = vmax.f32 %v122_v29, 0.0 }
  0xe6   :  { %v160_v38 = vmul.f32 %v155_v36, %v136_v31  ;;  %v165_v41 = vsel %vm161_vm1, %v159_v34, 0.0 }
  0xe7   :  { %v158_v35 = vmul.f32 %v145_v24, %v134_v32  ;;  %v162_v37 = vsel %vm161_vm1, %v157_v30, 0.0 }
  0xe8   :  { %v167_v43 = vsel %vm161_vm1, %v160_v38, 0.0 }
  0xe9   :  { %v163_v39 = vsel %vm161_vm1, %v158_v35, 0.0 }
  0xea   :  { %v164_v40 = vadd.f32 %v163_v39, %v162_v37 }
  0xec   :  { %v166_v42 = vadd.f32 %v165_v41, %v164_v40 }
  0xee   :  { %v168_v44 = vadd.f32 %v167_v43, %v166_v42 }
  0xf0   :  { %v169_v45 = vrot.slane %v168_v44, 4 }
  0xf2   :  { %v170_v46 = vadd.f32 %v169_v45, %v168_v44 }
  0xf4   :  { %v171_v47 = vrot.slane %v170_v46, 2 }
  0xf6   :  { %v172_v48 = vadd.f32 %v171_v47, %v170_v46 }
  0xf8   :  { %v173_v49 = vrot.slane %v172_v48, 1 }
  0xfa   :  { %v174_v51 = vadd.f32 %v173_v49, %v172_v48 }
  0xfc   :  { %v177_v52 = vadd.f32 %v176_v50, %v174_v51 }
  0xfe   :  { %vm185_vm2 = vcmp.ge.f32.partialorder %v177_v52, 0.0  ;;  %v178_v53 = vand.u32 2147483647, %v177_v52  ;;  %v192_v63 = vmul.f32 %v190_v54, %v177_v52  ;;  %v191_v0 = vmax.f32 %v177_v52, 0.0 }
  0xff   :  { %v259_v56 = vsel %vm185_vm2, 1.0, %v314_v55 }
 0x100   :  { %vm199_vm4 = vcmp.eq.f32.partialorder %v259_v56, %v190_v54  ;;  %v179_v57 = vsub.f32 0.0, %v178_v53  ;;  %v193_v4 = vsub.f32 %v191_v0, %v192_v63 }
 0x101   :  { %v260_v58 = vsel %vm199_vm4, 1.0, %v314_v55 }
 0x102   :  { %v214_v59 = vsel %vm188_vm3, %v260_v58, 0.0  ;;  %v180_v60 = vmul.f32 1.442695, %v179_v57 }
 0x103   :  { %215 = vadd.xlane.f32.xlu1 %v214_v59 }
 0x104   :  { %283 = vpow2.f32 %v180_v60 }
 0x10e   :  { %v284_v61 = vpop.eup %283 }
 0x10f   :  { %v182_v62 = vadd.f32 1.0, %v284_v61 }
 0x111   :  { %285 = vrcp.f32 %v182_v62 }
 0x112   :  { %287 = vlog2.f32 %v182_v62 }
 0x11b   :  { %v286_v1 = vpop.eup %285 }
 0x11c   :  { %v288_v2 = vpop.eup %287  ;;  %v186_v3 = vmul.f32 %v286_v1, %v284_v61 }
 0x11d   :  { %v195_v5 = vmul.f32 0.6931472, %v288_v2 }
 0x11e   :  { %v187_v6 = vsel %vm185_vm2, %v286_v1, %v186_v3 }
 0x11f   :  { %189 = vst.msk [vmem:[%s443_s6] sm:$0x1] %vm188_vm3, %v187_v6  ;;  %v196_v7 = vadd.f32 %v195_v5, %v193_v4 }
 0x121   :  { %v202_v8 = vsel %vm188_vm3, %v196_v7, 0.0 }
 0x122   :  { %203 = vadd.xlane.f32.xlu0 %v202_v8 }
 0x190   :  { %v216_v9 = vpop.xlane.xlu1 %215 }
 0x191   :  { %v217_v10 = vrot.slane %v216_v9, 4 }
 0x193   :  { %v218_v11 = vadd.f32 %v217_v10, %v216_v9 }
 0x195   :  { %v219_v12 = vrot.slane %v218_v11, 2 }
 0x197   :  { %v220_v16 = vadd.f32 %v219_v12, %v218_v11 }
 0x199   :  { %v221_v19 = vrot.slane %v220_v16, 1 }
 0x19b   :  { %v222_v22 = vadd.f32 %v221_v19, %v220_v16 }
 0x1af   :  { %v204_v13 = vpop.xlane.xlu0 %203 }
 0x1b0   :  { %v205_v14 = vrot.slane %v204_v13, 4 }
 0x1b2   :  { %v206_v15 = vadd.f32 %v205_v14, %v204_v13 }
 0x1b4   :  { %v207_v17 = vrot.slane %v206_v15, 2 }
 0x1b6   :  { %v208_v18 = vadd.f32 %v207_v17, %v206_v15 }
 0x1b8   :  { %v209_v20 = vrot.slane %v208_v18, 1 }
 0x1ba   :  { %v210_v21 = vadd.f32 %v209_v20, %v208_v18 }
 0x1bc   :  { %271 = vpush %v210_v21 }
 0x1bd   :  { %273 = vpush %v222_v22 }
 0x1ed   :  { %s272_s6 = spop %271 }
 0x1ee   :  { %s274_s27 = spop %273  ;;  %213 = sst [smem:[#allocation3]] %s272_s6 }
 0x1ef   :  { %225 = sst [smem:[#allocation5]] %s274_s27 }
 0x1f0   :  { %298 = shalt.err (!%p295_p2)
}
 0x1f1   :  { %s315_s0 = smov [#allocation3]   ;;  %s299_s17 = scalar_lea.hbm %s445_s8, 16 }
 0x1f2   :  { %235 = dma.smem_to_hbm %s315_s0, 16, %s444_s7, [#allocation4]  }
 0x1f3   :  { %p300_p3 = scmp.ne.s32.totalorder %s445_s8, %s299_s17  ;;  %p303_p4 = scmp.lt.u32.totalorder %s299_s17, %s445_s8 }
 0x1f5   :  { %p305_p5 = pnand %p303_p4, %p300_p3 }
 0x1f7   :  { %308 = shalt.err (!%p305_p5)
}
 0x1f8   :  { %s316_s22 = smov [#allocation5]  }
 0x1f9   :  { %243 = dma.smem_to_hbm %s316_s22, 16, %s445_s8, [#allocation6]  }
 0x1fa   :  { %309 = dma.done.wait [#allocation4], 16  }
 0x1fb   :  { %310 = vsyncadd [#allocation4], 4294967280 }
 0x1fc   :  { %311 = dma.done.wait [#allocation6], 16  }
 0x1fd   :  { %312 = vsyncadd [#allocation6], 4294967280 }
 0x1fe   :  { %252 = sfence }
 0x1ff   :  { %253 = vsyncpa [#allocation4], 1 }
 0x200   :  { %254 = vsyncpa [#allocation6], 1 }

</bundles_post_ra>
